<compile_context>
chip_gen: v7x
topology: tpu7x:2x2x1
jax: 0.10.0
libtpu: 0.0.40
codegen_flags: <defaults>
</compile_context>

<pallas_src>
import functools

import jax
import jax.numpy as jnp
import numpy as np
from jax.experimental import pallas as pl
from jax.experimental.pallas import tpu as pltpu


# ------------------------------------------------------------------
# Fused autoencoder kernel (one batch element per grid step)
# ------------------------------------------------------------------
def _fused_ae_kernel(x1p_ref, ssel_ref, w1_ref, b1_ref, w2_ref, b2_ref,
                     w3_ref, b3_ref, w4_ref, b4_ref, out_ref, *,
                     n_taps, m2, cin2, cout2):
    f32 = jnp.float32

    # encoder conv1: im2col'd patches @ W1 + b1, ReLU              (64, 8)
    a1 = jnp.dot(x1p_ref[...], w1_ref[...], preferred_element_type=f32)
    a1 = jnp.maximum(a1 + b1_ref[...], 0.0)

    # encoder conv2: in-VMEM "im2col" via constant 0/1 selection matmul,
    # then 9 accumulated tap matmuls (kernel taps share the same 16 outputs).
    p = jnp.dot(ssel_ref[...], a1, preferred_element_type=f32)     # (9*16, 8)
    acc = jnp.zeros((m2, cout2), f32)
    for t in range(n_taps):                                        # unrolled
        acc = acc + jnp.dot(p[t * m2:(t + 1) * m2, :],
                            w2_ref[t * cin2:(t + 1) * cin2, :],
                            preferred_element_type=f32)
    a2 = jnp.maximum(acc + b2_ref[...], 0.0)                       # (16, 16)

    # decoder deconv1 (k=2, s=2): per-z-pixel matmul + bias, ReLU  (16, 32)
    d1 = jnp.dot(a2, w3_ref[...], preferred_element_type=f32)
    d1 = jnp.maximum(d1 + b3_ref[...], 0.0)

    # decoder deconv2 (k=2, s=2): block-diagonal per-subpixel matmul + bias
    out = jnp.dot(d1, w4_ref[...], preferred_element_type=f32) + b4_ref[...]
    out_ref[...] = out.astype(out_ref.dtype)                       # (16, 64)


# ------------------------------------------------------------------
# Host/XLA-side glue (tiny, static-shape only)
# ------------------------------------------------------------------
def _im2col(x_nhwc, k, stride, pad):
    """kxk patches; rows ordered (n, oh, ow), cols ordered (kh, kw, c)."""
    x = jnp.pad(x_nhwc, ((0, 0), (pad, pad), (pad, pad), (0, 0)))
    N, H, W, C = x.shape
    oh = (H - k) // stride + 1
    ow = (W - k) // stride + 1
    taps = []
    for i in range(k):
        for j in range(k):
            taps.append(x[:, i:i + stride * oh:stride, j:j + stride * ow:stride, :])
    p = jnp.stack(taps, axis=3)                      # (N, oh, ow, k*k, C)
    return p.reshape(N * oh * ow, k * k * C), oh, ow


def _conv_select_matrix(ih_h, ih_w, oh_h, oh_w, k, stride, pad):
    """0/1 matrix S (k*k*oh_h*oh_w, ih_h*ih_w): row (tap, r, c) selects the
    padded-conv input pixel for that tap/output position (all-zero row = pad)."""
    S = np.zeros((k * k * oh_h * oh_w, ih_h * ih_w), np.float32)
    for di in range(k):
        for dj in range(k):
            t = di * k + dj
            for r in range(oh_h):
                for c in range(oh_w):
                    ih = stride * r + di - pad
                    iw = stride * c + dj - pad
                    if 0 <= ih < ih_h and 0 <= iw < ih_w:
                        S[(t * oh_h + r) * oh_w + c, ih * ih_w + iw] = 1.0
    return S


# ------------------------------------------------------------------
# Autoencoder forward (NCHW in / NCHW out, like the PyTorch module)
# ------------------------------------------------------------------
def autoencoder_forward(x_nchw, params):
    N, Cin, H, W = x_nchw.shape
    x_nhwc = jnp.transpose(x_nchw, (0, 2, 3, 1)).astype(jnp.float32)

    # conv1 im2col (only layer whose patches are built from HBM-resident data)
    x1p, oh1, ow1 = _im2col(x_nhwc, k=3, stride=2, pad=1)          # (N*64, 36)

    c1o = params["enc1_w"].shape[0]                                # 8
    c2o, c2i = params["enc2_w"].shape[0], params["enc2_w"].shape[1]  # 16, 8
    d1o = params["dec1_w"].shape[1]                                # 8
    d2o = params["dec2_w"].shape[1]                                # 4

    # weight repacking (rows/cols ordered (kh, kw, c))
    w1 = jnp.transpose(params["enc1_w"], (2, 3, 1, 0)).reshape(9 * Cin, c1o)
    b1 = params["enc1_b"].reshape(1, c1o)
    w2 = jnp.transpose(params["enc2_w"], (2, 3, 1, 0)).reshape(9 * c2i, c2o)
    b2 = params["enc2_b"].reshape(1, c2o)
    # deconv1: (Cin, Cout, kH, kW) -> (Cin, kH*kW*Cout); bias tiled over (kh, kw)
    w3 = jnp.transpose(params["dec1_w"], (0, 2, 3, 1)).reshape(c2o, 4 * d1o)
    b3 = jnp.tile(params["dec1_b"], 4).reshape(1, 4 * d1o)
    # deconv2 applied per (kh1, kw1) subpixel -> block-diagonal (32, 64)
    w4s = jnp.transpose(params["dec2_w"], (0, 2, 3, 1)).reshape(d1o, 4 * d2o)
    w4 = jnp.kron(jnp.eye(4, dtype=jnp.float32), w4s)
    b4 = jnp.tile(params["dec2_b"], 16).reshape(1, 16 * d2o)

    # conv2 geometry + constant in-kernel gather matrix (built at trace time)
    oh2 = (oh1 + 2 - 3) // 2 + 1
    ow2 = (ow1 + 2 - 3) // 2 + 1
    ssel = jnp.asarray(_conv_select_matrix(oh1, ow1, oh2, ow2, k=3, stride=2, pad=1))

    m1 = oh1 * ow1          # conv1 positions / batch element (64)
    m2 = oh2 * ow2          # conv2 positions / batch element (16)
    kcols = 9 * Cin         # 36

    flops = 2 * N * (m1 * kcols * c1o            # conv1
                     + (9 * m2) * m1 * c1o       # selection gather
                     + 9 * m2 * c2i * c2o        # conv2 taps
                     + m2 * c2o * (4 * d1o)      # deconv1
                     + m2 * (4 * d1o) * (16 * d2o))  # deconv2
    operands = (x1p, ssel, w1, b1, w2, b2, w3, b3, w4, b4)
    bytes_accessed = sum(int(np.prod(a.shape)) * 4 for a in operands) \
        + N * m2 * 16 * d2o * 4

    kernel = functools.partial(_fused_ae_kernel,
                               n_taps=9, m2=m2, cin2=c2i, cout2=c2o)
    out2d = pl.pallas_call(
        kernel,
        out_shape=jax.ShapeDtypeStruct((N * m2, 16 * d2o), jnp.float32),
        grid=(N,),
        in_specs=[
            pl.BlockSpec((m1, kcols), lambda i: (i, 0)),       # conv1 patches (per batch)
            pl.BlockSpec((9 * m2, m1), lambda i: (0, 0)),      # conv2 selection (shared)
            pl.BlockSpec((kcols, c1o), lambda i: (0, 0)),      # W1
            pl.BlockSpec((1, c1o), lambda i: (0, 0)),          # b1
            pl.BlockSpec((9 * c2i, c2o), lambda i: (0, 0)),    # W2 (taps stacked)
            pl.BlockSpec((1, c2o), lambda i: (0, 0)),          # b2
            pl.BlockSpec((c2o, 4 * d1o), lambda i: (0, 0)),    # W3
            pl.BlockSpec((1, 4 * d1o), lambda i: (0, 0)),      # b3
            pl.BlockSpec((4 * d1o, 16 * d2o), lambda i: (0, 0)),  # W4 block-diag
            pl.BlockSpec((1, 16 * d2o), lambda i: (0, 0)),     # b4
        ],
        out_specs=pl.BlockSpec((m2, 16 * d2o), lambda i: (i, 0)),
        compiler_params=pltpu.CompilerParams(
            dimension_semantics=("parallel",)),                # v7x: 2 TCs split batch
        cost_estimate=pl.CostEstimate(
            flops=flops, transcendentals=0, bytes_accessed=bytes_accessed),
    )(*operands)

    # final boundary rearrange (8 KB): (n, oh2, ow2, kh1, kw1, kh2, kw2, c) -> NCHW
    out = out2d.reshape(N, oh2, ow2, 2, 2, 2, 2, d2o)
    out = jnp.transpose(out, (0, 7, 1, 3, 5, 2, 4, 6))
    return out.reshape(N, d2o, 4 * oh2, 4 * ow2)
    # TODO(synk): final activation depends on the user-supplied decoder; left linear.


# ------------------------------------------------------------------
# Pure-JAX reference (straightforward PyTorch-semantics implementation)
# ------------------------------------------------------------------
def _reference_forward(x, params):
    hp = jax.lax.Precision.HIGHEST

    def conv(x, w, b, stride, pad):
        N, _, H, W = x.shape
        Cout, Cin, kH, kW = w.shape
        xp = jnp.pad(x, ((0, 0), (0, 0), (pad, pad), (pad, pad)))
        oh = (H + 2 * pad - kH) // stride + 1
        ow = (W + 2 * pad - kW) // stride + 1
        out = jnp.broadcast_to(b[None, :, None, None], (N, Cout, oh, ow))
        for di in range(kH):
            for dj in range(kW):
                xs = xp[:, :, di:di + stride * oh:stride, dj:dj + stride * ow:stride]
                out = out + jnp.einsum('ncij,oc->noij', xs, w[:, :, di, dj],
                                       precision=hp)
        return out

    def deconv(x, w, b):   # ConvTranspose2d, kernel=2, stride=2, padding=0
        N, Cin, H, W = x.shape
        Cout, kH, kW = w.shape[1], w.shape[2], w.shape[3]
        y = jnp.einsum('ncij,cokl->noikjl', x, w, precision=hp)
        y = y.reshape(N, Cout, H * kH, W * kW)
        return y + b[None, :, None, None]

    h = jax.nn.relu(conv(x, params["enc1_w"], params["enc1_b"], 2, 1))
    h = jax.nn.relu(conv(h, params["enc2_w"], params["enc2_b"], 2, 1))
    h = jax.nn.relu(deconv(h, params["dec1_w"], params["dec1_b"]))
    return deconv(h, params["dec2_w"], params["dec2_b"])


def init_params(key):
    ks = jax.random.split(key, 8)

    def w(k, shape, fan_in):
        return jax.random.normal(k, shape, jnp.float32) * (1.0 / jnp.sqrt(fan_in))

    return {
        "enc1_w": w(ks[0], (8, 4, 3, 3), 4 * 9),
        "enc1_b": jax.random.normal(ks[1], (8,), jnp.float32) * 0.01,
        "enc2_w": w(ks[2], (16, 8, 3, 3), 8 * 9),
        "enc2_b": jax.random.normal(ks[3], (16,), jnp.float32) * 0.01,
        "dec1_w": w(ks[4], (16, 8, 2, 2), 16 * 4),   # ConvT: (Cin, Cout, kH, kW)
        "dec1_b": jax.random.normal(ks[5], (8,), jnp.float32) * 0.01,
        "dec2_w": w(ks[6], (8, 4, 2, 2), 8 * 4),
        "dec2_b": jax.random.normal(ks[7], (4,), jnp.float32) * 0.01,
    }


if __name__ == "__main__":
    key = jax.random.PRNGKey(0)
    k_params, k_x = jax.random.split(key)
    params = init_params(k_params)
    x = jax.random.normal(k_x, (2, 4, 16, 16), jnp.float32)   # NCHW

    out = jax.jit(autoencoder_forward)(x, params)
    out = jax.block_until_ready(out)
    assert out.shape == (2, 4, 16, 16), out.shape
    assert out.dtype == jnp.float32

    ref = _reference_forward(x, params)
    err = float(jnp.max(jnp.abs(out - ref)))
    assert err < 5e-2, f"mismatch vs reference: max |err| = {err}"
    print("KERNEL_OK")
</pallas_src>

<mosaic_0001>
module attributes {stable_mosaic.version = 11 : i64} {
  func.func @_fused_ae_kernel(%arg0: i32, %arg1: memref<64x36xf32, #tpu.memory_space<vmem>>, %arg2: memref<144x64xf32, #tpu.memory_space<vmem>>, %arg3: memref<36x8xf32, #tpu.memory_space<vmem>>, %arg4: memref<1x8xf32, #tpu.memory_space<vmem>>, %arg5: memref<72x16xf32, #tpu.memory_space<vmem>>, %arg6: memref<1x16xf32, #tpu.memory_space<vmem>>, %arg7: memref<16x32xf32, #tpu.memory_space<vmem>>, %arg8: memref<1x32xf32, #tpu.memory_space<vmem>>, %arg9: memref<32x64xf32, #tpu.memory_space<vmem>>, %arg10: memref<1x64xf32, #tpu.memory_space<vmem>>, %arg11: memref<16x64xf32, #tpu.memory_space<vmem>>) attributes {dimension_semantics = [#tpu.dimension_semantics<parallel>], iteration_bounds = array<i64: 2>, scalar_prefetch = 0 : i64, scratch_operands = 0 : i64, tpu.core_type = #tpu.core_type<tc>, window_params = [{transform_indices = @transform_0, window_bounds = array<i64: 64, 36>}, {pipeline_mode = #tpu.pipeline_mode<synchronous>, transform_indices = @transform_1, window_bounds = array<i64: 144, 64>}, {pipeline_mode = #tpu.pipeline_mode<synchronous>, transform_indices = @transform_2, window_bounds = array<i64: 36, 8>}, {pipeline_mode = #tpu.pipeline_mode<synchronous>, transform_indices = @transform_3, window_bounds = array<i64: 1, 8>}, {pipeline_mode = #tpu.pipeline_mode<synchronous>, transform_indices = @transform_4, window_bounds = array<i64: 72, 16>}, {pipeline_mode = #tpu.pipeline_mode<synchronous>, transform_indices = @transform_5, window_bounds = array<i64: 1, 16>}, {pipeline_mode = #tpu.pipeline_mode<synchronous>, transform_indices = @transform_6, window_bounds = array<i64: 16, 32>}, {pipeline_mode = #tpu.pipeline_mode<synchronous>, transform_indices = @transform_7, window_bounds = array<i64: 1, 32>}, {pipeline_mode = #tpu.pipeline_mode<synchronous>, transform_indices = @transform_8, window_bounds = array<i64: 32, 64>}, {pipeline_mode = #tpu.pipeline_mode<synchronous>, transform_indices = @transform_9, window_bounds = array<i64: 1, 64>}, {transform_indices = @transform_10, window_bounds = array<i64: 16, 64>}]} {
    %c0 = arith.constant 0 : index
    %c0_0 = arith.constant 0 : index
    %0 = vector.load %arg1[%c0, %c0_0] : memref<64x36xf32, #tpu.memory_space<vmem>>, vector<64x36xf32>
    %c0_1 = arith.constant 0 : index
    %c0_2 = arith.constant 0 : index
    %1 = vector.load %arg3[%c0_1, %c0_2] : memref<36x8xf32, #tpu.memory_space<vmem>>, vector<36x8xf32>
    %cst = arith.constant dense<0.000000e+00> : vector<64x8xf32>
    %2 = tpu.matmul %0, %1, %cst {dimension_numbers = #tpu.dot_dimension_numbers<[1], [0], [0], [1], [0, 0, 1, 1], [], []>} : vector<64x36xf32>, vector<36x8xf32>, vector<64x8xf32> -> vector<64x8xf32>
    %c0_3 = arith.constant 0 : index
    %c0_4 = arith.constant 0 : index
    %3 = vector.load %arg4[%c0_3, %c0_4] : memref<1x8xf32, #tpu.memory_space<vmem>>, vector<1x8xf32>
    %4 = vector.broadcast %3 : vector<1x8xf32> to vector<64x8xf32>
    %5 = arith.addf %2, %4 : vector<64x8xf32>
    %cst_5 = arith.constant 0.000000e+00 : f32
    %6 = vector.broadcast %cst_5 : f32 to vector<64x8xf32>
    %7 = arith.maximumf %5, %6 : vector<64x8xf32>
    %c0_6 = arith.constant 0 : index
    %c0_7 = arith.constant 0 : index
    %8 = vector.load %arg2[%c0_6, %c0_7] : memref<144x64xf32, #tpu.memory_space<vmem>>, vector<144x64xf32>
    %cst_8 = arith.constant dense<0.000000e+00> : vector<144x8xf32>
    %9 = tpu.matmul %8, %7, %cst_8 {dimension_numbers = #tpu.dot_dimension_numbers<[1], [0], [0], [1], [0, 0, 1, 1], [], []>} : vector<144x64xf32>, vector<64x8xf32>, vector<144x8xf32> -> vector<144x8xf32>
    %cst_9 = arith.constant 0.000000e+00 : f32
    %10 = vector.broadcast %cst_9 : f32 to vector<16x16xf32>
    %11 = vector.extract_strided_slice %9 {offsets = [0, 0], sizes = [16, 8], strides = [1, 1]} : vector<144x8xf32> to vector<16x8xf32>
    %c0_10 = arith.constant 0 : index
    %c0_11 = arith.constant 0 : index
    %12 = vector.load %arg5[%c0_10, %c0_11] : memref<72x16xf32, #tpu.memory_space<vmem>>, vector<8x16xf32>
    %cst_12 = arith.constant dense<0.000000e+00> : vector<16x16xf32>
    %13 = tpu.matmul %11, %12, %cst_12 {dimension_numbers = #tpu.dot_dimension_numbers<[1], [0], [0], [1], [0, 0, 1, 1], [], []>} : vector<16x8xf32>, vector<8x16xf32>, vector<16x16xf32> -> vector<16x16xf32>
    %14 = arith.addf %10, %13 : vector<16x16xf32>
    %15 = vector.extract_strided_slice %9 {offsets = [16, 0], sizes = [16, 8], strides = [1, 1]} : vector<144x8xf32> to vector<16x8xf32>
    %c8 = arith.constant 8 : index
    %c0_13 = arith.constant 0 : index
    %16 = vector.load %arg5[%c8, %c0_13] : memref<72x16xf32, #tpu.memory_space<vmem>>, vector<8x16xf32>
    %cst_14 = arith.constant dense<0.000000e+00> : vector<16x16xf32>
    %17 = tpu.matmul %15, %16, %cst_14 {dimension_numbers = #tpu.dot_dimension_numbers<[1], [0], [0], [1], [0, 0, 1, 1], [], []>} : vector<16x8xf32>, vector<8x16xf32>, vector<16x16xf32> -> vector<16x16xf32>
    %18 = arith.addf %14, %17 : vector<16x16xf32>
    %19 = vector.extract_strided_slice %9 {offsets = [32, 0], sizes = [16, 8], strides = [1, 1]} : vector<144x8xf32> to vector<16x8xf32>
    %c16 = arith.constant 16 : index
    %c0_15 = arith.constant 0 : index
    %20 = vector.load %arg5[%c16, %c0_15] : memref<72x16xf32, #tpu.memory_space<vmem>>, vector<8x16xf32>
    %cst_16 = arith.constant dense<0.000000e+00> : vector<16x16xf32>
    %21 = tpu.matmul %19, %20, %cst_16 {dimension_numbers = #tpu.dot_dimension_numbers<[1], [0], [0], [1], [0, 0, 1, 1], [], []>} : vector<16x8xf32>, vector<8x16xf32>, vector<16x16xf32> -> vector<16x16xf32>
    %22 = arith.addf %18, %21 : vector<16x16xf32>
    %23 = vector.extract_strided_slice %9 {offsets = [48, 0], sizes = [16, 8], strides = [1, 1]} : vector<144x8xf32> to vector<16x8xf32>
    %c24 = arith.constant 24 : index
    %c0_17 = arith.constant 0 : index
    %24 = vector.load %arg5[%c24, %c0_17] : memref<72x16xf32, #tpu.memory_space<vmem>>, vector<8x16xf32>
    %cst_18 = arith.constant dense<0.000000e+00> : vector<16x16xf32>
    %25 = tpu.matmul %23, %24, %cst_18 {dimension_numbers = #tpu.dot_dimension_numbers<[1], [0], [0], [1], [0, 0, 1, 1], [], []>} : vector<16x8xf32>, vector<8x16xf32>, vector<16x16xf32> -> vector<16x16xf32>
    %26 = arith.addf %22, %25 : vector<16x16xf32>
    %27 = vector.extract_strided_slice %9 {offsets = [64, 0], sizes = [16, 8], strides = [1, 1]} : vector<144x8xf32> to vector<16x8xf32>
    %c32 = arith.constant 32 : index
    %c0_19 = arith.constant 0 : index
    %28 = vector.load %arg5[%c32, %c0_19] : memref<72x16xf32, #tpu.memory_space<vmem>>, vector<8x16xf32>
    %cst_20 = arith.constant dense<0.000000e+00> : vector<16x16xf32>
    %29 = tpu.matmul %27, %28, %cst_20 {dimension_numbers = #tpu.dot_dimension_numbers<[1], [0], [0], [1], [0, 0, 1, 1], [], []>} : vector<16x8xf32>, vector<8x16xf32>, vector<16x16xf32> -> vector<16x16xf32>
    %30 = arith.addf %26, %29 : vector<16x16xf32>
    %31 = vector.extract_strided_slice %9 {offsets = [80, 0], sizes = [16, 8], strides = [1, 1]} : vector<144x8xf32> to vector<16x8xf32>
    %c40 = arith.constant 40 : index
    %c0_21 = arith.constant 0 : index
    %32 = vector.load %arg5[%c40, %c0_21] : memref<72x16xf32, #tpu.memory_space<vmem>>, vector<8x16xf32>
    %cst_22 = arith.constant dense<0.000000e+00> : vector<16x16xf32>
    %33 = tpu.matmul %31, %32, %cst_22 {dimension_numbers = #tpu.dot_dimension_numbers<[1], [0], [0], [1], [0, 0, 1, 1], [], []>} : vector<16x8xf32>, vector<8x16xf32>, vector<16x16xf32> -> vector<16x16xf32>
    %34 = arith.addf %30, %33 : vector<16x16xf32>
    %35 = vector.extract_strided_slice %9 {offsets = [96, 0], sizes = [16, 8], strides = [1, 1]} : vector<144x8xf32> to vector<16x8xf32>
    %c48 = arith.constant 48 : index
    %c0_23 = arith.constant 0 : index
    %36 = vector.load %arg5[%c48, %c0_23] : memref<72x16xf32, #tpu.memory_space<vmem>>, vector<8x16xf32>
    %cst_24 = arith.constant dense<0.000000e+00> : vector<16x16xf32>
    %37 = tpu.matmul %35, %36, %cst_24 {dimension_numbers = #tpu.dot_dimension_numbers<[1], [0], [0], [1], [0, 0, 1, 1], [], []>} : vector<16x8xf32>, vector<8x16xf32>, vector<16x16xf32> -> vector<16x16xf32>
    %38 = arith.addf %34, %37 : vector<16x16xf32>
    %39 = vector.extract_strided_slice %9 {offsets = [112, 0], sizes = [16, 8], strides = [1, 1]} : vector<144x8xf32> to vector<16x8xf32>
    %c56 = arith.constant 56 : index
    %c0_25 = arith.constant 0 : index
    %40 = vector.load %arg5[%c56, %c0_25] : memref<72x16xf32, #tpu.memory_space<vmem>>, vector<8x16xf32>
    %cst_26 = arith.constant dense<0.000000e+00> : vector<16x16xf32>
    %41 = tpu.matmul %39, %40, %cst_26 {dimension_numbers = #tpu.dot_dimension_numbers<[1], [0], [0], [1], [0, 0, 1, 1], [], []>} : vector<16x8xf32>, vector<8x16xf32>, vector<16x16xf32> -> vector<16x16xf32>
    %42 = arith.addf %38, %41 : vector<16x16xf32>
    %43 = vector.extract_strided_slice %9 {offsets = [128, 0], sizes = [16, 8], strides = [1, 1]} : vector<144x8xf32> to vector<16x8xf32>
    %c64 = arith.constant 64 : index
    %c0_27 = arith.constant 0 : index
    %44 = vector.load %arg5[%c64, %c0_27] : memref<72x16xf32, #tpu.memory_space<vmem>>, vector<8x16xf32>
    %cst_28 = arith.constant dense<0.000000e+00> : vector<16x16xf32>
    %45 = tpu.matmul %43, %44, %cst_28 {dimension_numbers = #tpu.dot_dimension_numbers<[1], [0], [0], [1], [0, 0, 1, 1], [], []>} : vector<16x8xf32>, vector<8x16xf32>, vector<16x16xf32> -> vector<16x16xf32>
    %46 = arith.addf %42, %45 : vector<16x16xf32>
    %c0_29 = arith.constant 0 : index
    %c0_30 = arith.constant 0 : index
    %47 = vector.load %arg6[%c0_29, %c0_30] : memref<1x16xf32, #tpu.memory_space<vmem>>, vector<1x16xf32>
    %48 = vector.broadcast %47 : vector<1x16xf32> to vector<16x16xf32>
    %49 = arith.addf %46, %48 : vector<16x16xf32>
    %cst_31 = arith.constant 0.000000e+00 : f32
    %50 = vector.broadcast %cst_31 : f32 to vector<16x16xf32>
    %51 = arith.maximumf %49, %50 : vector<16x16xf32>
    %c0_32 = arith.constant 0 : index
    %c0_33 = arith.constant 0 : index
    %52 = vector.load %arg7[%c0_32, %c0_33] : memref<16x32xf32, #tpu.memory_space<vmem>>, vector<16x32xf32>
    %cst_34 = arith.constant dense<0.000000e+00> : vector<16x32xf32>
    %53 = tpu.matmul %51, %52, %cst_34 {dimension_numbers = #tpu.dot_dimension_numbers<[1], [0], [0], [1], [0, 0, 1, 1], [], []>} : vector<16x16xf32>, vector<16x32xf32>, vector<16x32xf32> -> vector<16x32xf32>
    %c0_35 = arith.constant 0 : index
    %c0_36 = arith.constant 0 : index
    %54 = vector.load %arg8[%c0_35, %c0_36] : memref<1x32xf32, #tpu.memory_space<vmem>>, vector<1x32xf32>
    %55 = vector.broadcast %54 : vector<1x32xf32> to vector<16x32xf32>
    %56 = arith.addf %53, %55 : vector<16x32xf32>
    %cst_37 = arith.constant 0.000000e+00 : f32
    %57 = vector.broadcast %cst_37 : f32 to vector<16x32xf32>
    %58 = arith.maximumf %56, %57 : vector<16x32xf32>
    %c0_38 = arith.constant 0 : index
    %c0_39 = arith.constant 0 : index
    %59 = vector.load %arg9[%c0_38, %c0_39] : memref<32x64xf32, #tpu.memory_space<vmem>>, vector<32x64xf32>
    %cst_40 = arith.constant dense<0.000000e+00> : vector<16x64xf32>
    %60 = tpu.matmul %58, %59, %cst_40 {dimension_numbers = #tpu.dot_dimension_numbers<[1], [0], [0], [1], [0, 0, 1, 1], [], []>} : vector<16x32xf32>, vector<32x64xf32>, vector<16x64xf32> -> vector<16x64xf32>
    %c0_41 = arith.constant 0 : index
    %c0_42 = arith.constant 0 : index
    %61 = vector.load %arg10[%c0_41, %c0_42] : memref<1x64xf32, #tpu.memory_space<vmem>>, vector<1x64xf32>
    %62 = vector.broadcast %61 : vector<1x64xf32> to vector<16x64xf32>
    %63 = arith.addf %60, %62 : vector<16x64xf32>
    %c0_43 = arith.constant 0 : index
    %c0_44 = arith.constant 0 : index
    %64 = vector.load %arg11[%c0_43, %c0_44] : memref<16x64xf32, #tpu.memory_space<vmem>>, vector<16x64xf32>
    tpu.vector_store %arg11[%c0_43, %c0_44], %63 {strides = array<i32>} : memref<16x64xf32, #tpu.memory_space<vmem>>, vector<16x64xf32>,
    return
  }
  func.func @transform_0(%arg0: i32) -> (i32, i32) {
    %c0_i32 = arith.constant 0 : i32
    %c0_i32_0 = arith.constant 0 : i32
    return %arg0, %c0_i32 : i32, i32
  }
  func.func @transform_1(%arg0: i32) -> (i32, i32) {
    %c0_i32 = arith.constant 0 : i32
    %c0_i32_0 = arith.constant 0 : i32
    %c0_i32_1 = arith.constant 0 : i32
    return %c0_i32, %c0_i32_0 : i32, i32
  }
  func.func @transform_2(%arg0: i32) -> (i32, i32) {
    %c0_i32 = arith.constant 0 : i32
    %c0_i32_0 = arith.constant 0 : i32
    %c0_i32_1 = arith.constant 0 : i32
    return %c0_i32, %c0_i32_0 : i32, i32
  }
  func.func @transform_3(%arg0: i32) -> (i32, i32) {
    %c0_i32 = arith.constant 0 : i32
    %c0_i32_0 = arith.constant 0 : i32
    %c0_i32_1 = arith.constant 0 : i32
    return %c0_i32, %c0_i32_0 : i32, i32
  }
  func.func @transform_4(%arg0: i32) -> (i32, i32) {
    %c0_i32 = arith.constant 0 : i32
    %c0_i32_0 = arith.constant 0 : i32
    %c0_i32_1 = arith.constant 0 : i32
    return %c0_i32, %c0_i32_0 : i32, i32
  }
  func.func @transform_5(%arg0: i32) -> (i32, i32) {
    %c0_i32 = arith.constant 0 : i32
    %c0_i32_0 = arith.constant 0 : i32
    %c0_i32_1 = arith.constant 0 : i32
    return %c0_i32, %c0_i32_0 : i32, i32
  }
  func.func @transform_6(%arg0: i32) -> (i32, i32) {
    %c0_i32 = arith.constant 0 : i32
    %c0_i32_0 = arith.constant 0 : i32
    %c0_i32_1 = arith.constant 0 : i32
    return %c0_i32, %c0_i32_0 : i32, i32
  }
  func.func @transform_7(%arg0: i32) -> (i32, i32) {
    %c0_i32 = arith.constant 0 : i32
    %c0_i32_0 = arith.constant 0 : i32
    %c0_i32_1 = arith.constant 0 : i32
    return %c0_i32, %c0_i32_0 : i32, i32
  }
  func.func @transform_8(%arg0: i32) -> (i32, i32) {
    %c0_i32 = arith.constant 0 : i32
    %c0_i32_0 = arith.constant 0 : i32
    %c0_i32_1 = arith.constant 0 : i32
    return %c0_i32, %c0_i32_0 : i32, i32
  }
  func.func @transform_9(%arg0: i32) -> (i32, i32) {
    %c0_i32 = arith.constant 0 : i32
    %c0_i32_0 = arith.constant 0 : i32
    %c0_i32_1 = arith.constant 0 : i32
    return %c0_i32, %c0_i32_0 : i32, i32
  }
  func.func @transform_10(%arg0: i32) -> (i32, i32) {
    %c0_i32 = arith.constant 0 : i32
    %c0_i32_0 = arith.constant 0 : i32
    return %arg0, %c0_i32 : i32, i32
  }
}

</mosaic_0001>

<bundles_post_ra>
// kernel: tile.18
= control target key start
LH: loop header
LB: loop body
LE: loop exit
PB: predicated region body
PF: predicated region fallthrough
CT: control target
= control target key end

     0   :  { %s28_s0 = inlined_call_operand.vmem [shape: f32[4], index: 0, kind: input, shape index: {}]   ;;  %s29_s1 = inlined_call_operand.vmem [shape: f32[16,4], index: 1, kind: output, shape index: {}]  }
   0x1   :  { %v4_v0 = vld [vmem:[%s28_s0] ss:$0 sm:$0xff] }
   0x2   :  { %5 = vst [vmem:[%s29_s1] sm:$0xff] %v4_v0  ;;  %8 = vst [vmem:[%s29_s1 + $0x8] sm:$0xff] %v4_v0 }

// kernel: tile.19
= control target key start
LH: loop header
LB: loop body
LE: loop exit
PB: predicated region body
PF: predicated region fallthrough
CT: control target
= control target key end

     0   :  { %s131_s10 = smov 60   ;;  %s132_s11 = smov 52   ;;  %vm3_vm0 = vcmask 31744   ;;  %vm9_vm1 = vcmask 523744   ;;  %vm15_vm2 = vcmask 490944   ;;  %vm21_vm3 = vcmask 458144   ;;  %s207_s0 = inlined_call_operand.vmem [shape: f32[16,4], index: 0, kind: input, shape index: {}]   ;;  %s208_s1 = inlined_call_operand.vmem [shape: f32[1,64], index: 1, kind: output, shape index: {}]  }
   0x1   :  { %v101_v0 = vld [vmem:[%s207_s0 + $0xf] sm:$0x1]   ;;  %v103_v1 = vld [vmem:[%s207_s0 + $0xd] sm:$0x1]   ;;  %v102_v2 = vld [vmem:[%s207_s0 + $0xe] sm:$0x1]  }
   0x2   :  { %7 = vrot.lane.b32.xlu0 %v101_v0, %s131_s10  ;;  %19 = vrot.lane.b32.xlu1 %v103_v1, %s132_s11  ;;  %v104_v3 = vld [vmem:[%s207_s0 + $0xc] sm:$0x1]   ;;  %s133_s16 = smov 56   ;;  %s134_s17 = smov 48   ;;  %v105_v4 = vld [vmem:[%s207_s0 + $0xb] sm:$0x1]  }
   0x3   :  { %v106_v5 = vld [vmem:[%s207_s0 + $0xa] sm:$0x1]   ;;  %v2_v6 = vld [vmem:[%s207_s0] sm:$0x1]   ;;  %s135_s24 = smov 44   ;;  %s136_s25 = smov 40  }
   0x4   :  { %4 = vst.msk [vmem:[#allocation0] sm:$0x1] %vm3_vm0, %v2_v6   ;;  %v107_v7 = vld [vmem:[%s207_s0 + $0x9] sm:$0x1]   ;;  %v108_v8 = vld [vmem:[%s207_s0 + $0x8] sm:$0x1]  }
   0x5   :  { %s137_s30 = smov 36   ;;  %s138_s2 = smov 32   ;;  %v109_v9 = vld [vmem:[%s207_s0 + $0x7] sm:$0x1]   ;;  %v110_v10 = vld [vmem:[%s207_s0 + $0x6] sm:$0x1]  }
   0x6   :  { %13 = vrot.lane.b32.xlu0 %v102_v2, %s133_s16  ;;  %25 = vrot.lane.b32.xlu1 %v104_v3, %s134_s17  ;;  %s139_s7 = smov 28   ;;  %s140_s8 = smov 24   ;;  %v111_v11 = vld [vmem:[%s207_s0 + $0x5] sm:$0x1]   ;;  %v112_v12 = vld [vmem:[%s207_s0 + $0x4] sm:$0x1]  }
   0x7   :  { %s141_s13 = smov 20   ;;  %s142_s14 = smov 16   ;;  %v113_v13 = vld [vmem:[%s207_s0 + $0x3] sm:$0x1]   ;;  %v114_v14 = vld [vmem:[%s207_s0 + $0x2] sm:$0x1]  }
   0x8   :  { %s143_s19 = smov 12   ;;  %s144_s20 = smov 8   ;;  %v115_v15 = vld [vmem:[%s207_s0 + $0x1] sm:$0x1]   ;;  %vm27_vm4 = vcmask 425344   ;;  %vm33_vm5 = vcmask 392544  }
   0x9   :  { %s145_s0 = smov 4   ;;  %vm39_vm6 = vcmask 359744   ;;  %vm45_vm7 = vcmask 326944   ;;  %vm51_vm8 = vcmask 294144   ;;  %vm57_vm9 = vcmask 261344  }
   0xa   :  { %31 = vrot.lane.b32.xlu0 %v105_v4, %s135_s24  ;;  %37 = vrot.lane.b32.xlu1 %v106_v5, %s136_s25  ;;  %vm63_vm10 = vcmask 228544   ;;  %vm69_vm11 = vcmask 195744   ;;  %vm75_vm12 = vcmask 162944   ;;  %vm81_vm13 = vcmask 130144  }
   0xb   :  { %vm87_vm14 = vcmask 97344   ;;  %vm93_vm15 = vcmask 64544  }
   0xe   :  { %43 = vrot.lane.b32.xlu0 %v107_v7, %s137_s30  ;;  %49 = vrot.lane.b32.xlu1 %v108_v8, %s138_s2 }
  0x12   :  { %55 = vrot.lane.b32.xlu0 %v109_v9, %s139_s7  ;;  %61 = vrot.lane.b32.xlu1 %v110_v10, %s140_s8 }
  0x16   :  { %67 = vrot.lane.b32.xlu0 %v111_v11, %s141_s13  ;;  %73 = vrot.lane.b32.xlu1 %v112_v12, %s142_s14 }
  0x1a   :  { %79 = vrot.lane.b32.xlu0 %v113_v13, %s143_s19  ;;  %85 = vrot.lane.b32.xlu1 %v114_v14, %s144_s20 }
  0x1e   :  { %91 = vrot.lane.b32.xlu0 %v115_v15, %s145_s0 }
  0x74   :  { %v8_v16 = vpop.permute.xlu0 %7   ;;  %v20_v17 = vpop.permute.xlu1 %19  }
  0x75   :  { %10 = vst.msk [vmem:[#allocation0] sm:$0x1] %vm9_vm1, %v8_v16  }
  0x78   :  { %v14_v18 = vpop.permute.xlu0 %13   ;;  %v26_v19 = vpop.permute.xlu1 %25  }
  0x79   :  { %16 = vst.msk [vmem:[#allocation0] sm:$0x1] %vm15_vm2, %v14_v18  }
  0x7a   :  { %22 = vst.msk [vmem:[#allocation0] sm:$0x1] %vm21_vm3, %v20_v17  }
  0x7b   :  { %28 = vst.msk [vmem:[#allocation0] sm:$0x1] %vm27_vm4, %v26_v19  }
  0x7c   :  { %v32_v20 = vpop.permute.xlu0 %31   ;;  %v38_v21 = vpop.permute.xlu1 %37  }
  0x7d   :  { %34 = vst.msk [vmem:[#allocation0] sm:$0x1] %vm33_vm5, %v32_v20  }
  0x7e   :  { %40 = vst.msk [vmem:[#allocation0] sm:$0x1] %vm39_vm6, %v38_v21  }
  0x80   :  { %v44_v22 = vpop.permute.xlu0 %43   ;;  %v50_v23 = vpop.permute.xlu1 %49  }
  0x81   :  { %46 = vst.msk [vmem:[#allocation0] sm:$0x1] %vm45_vm7, %v44_v22  }
  0x82   :  { %52 = vst.msk [vmem:[#allocation0] sm:$0x1] %vm51_vm8, %v50_v23  }
  0x84   :  { %v56_v24 = vpop.permute.xlu0 %55   ;;  %v62_v25 = vpop.permute.xlu1 %61  }
  0x85   :  { %58 = vst.msk [vmem:[#allocation0] sm:$0x1] %vm57_vm9, %v56_v24  }
  0x86   :  { %64 = vst.msk [vmem:[#allocation0] sm:$0x1] %vm63_vm10, %v62_v25  }
  0x88   :  { %v68_v26 = vpop.permute.xlu0 %67   ;;  %v74_v27 = vpop.permute.xlu1 %73  }
  0x89   :  { %70 = vst.msk [vmem:[#allocation0] sm:$0x1] %vm69_vm11, %v68_v26  }
  0x8a   :  { %76 = vst.msk [vmem:[#allocation0] sm:$0x1] %vm75_vm12, %v74_v27  }
  0x8c   :  { %v80_v28 = vpop.permute.xlu0 %79   ;;  %v86_v29 = vpop.permute.xlu1 %85  }
  0x8d   :  { %82 = vst.msk [vmem:[#allocation0] sm:$0x1] %vm81_vm13, %v80_v28  }
  0x8e   :  { %88 = vst.msk [vmem:[#allocation0] sm:$0x1] %vm87_vm14, %v86_v29  }
  0x90   :  { %v92_v30 = vpop.permute.xlu0 %91  }
  0x91   :  { %94 = vst.msk [vmem:[#allocation0] sm:$0x1] %vm93_vm15, %v92_v30  }
  0x98   :  { %v98_v31 = vld [vmem:[#allocation0] sm:$0x1] }
  0x99   :  { %100 = vst [vmem:[%s208_s1] sm:$0x1] %v98_v31 }

// kernel: tile.13
= control target key start
LH: loop header
LB: loop body
LE: loop exit
PB: predicated region body
PF: predicated region fallthrough
CT: control target
= control target key end

     0   :  { %s22_s0 = inlined_call_operand.vmem [shape: f32[8], index: 0, kind: input, shape index: {}]   ;;  %s23_s1 = inlined_call_operand.vmem [shape: f32[4,8], index: 1, kind: output, shape index: {}]  }
   0x1   :  { %v4_v0 = vld [vmem:[%s22_s0] ss:$0 sm:$0xff] }
   0x2   :  { %5 = vst [vmem:[%s23_s1] sm:$0xf] %v4_v0 }

// kernel: tile.14
= control target key start
LH: loop header
LB: loop body
LE: loop exit
PB: predicated region body
PF: predicated region fallthrough
CT: control target
= control target key end

     0   :  { %vm7_vm0 = vcmask 64512   ;;  %s37_s8 = smov 8   ;;  %s38_s9 = smov 16   ;;  %vm13_vm1 = vcmask 261312   ;;  %vm19_vm2 = vcmask 195712   ;;  %vm25_vm3 = vcmask 130112   ;;  %s55_s0 = inlined_call_operand.vmem [shape: f32[4,8], index: 0, kind: input, shape index: {}]   ;;  %s56_s1 = inlined_call_operand.vmem [shape: f32[1,32], index: 1, kind: output, shape index: {}]  }
   0x1   :  { %v4_v0 = vld [vmem:[%s55_s0] sm:$0xf]  ;;  %s36_s0 = smov 24  }
   0x2   :  { %5 = vst [vmem:[#allocation1] sm:$0xf] %v4_v0 }
   0x9   :  { %v10_v1 = vld [vmem:[#allocation1 + $0x3] sm:$0x1]   ;;  %v22_v2 = vld [vmem:[#allocation1 + $0x1] sm:$0x1]   ;;  %v6_v3 = vld [vmem:[#allocation1] sm:$0x1]  }
   0xa   :  { %11 = vrot.lane.b32.xlu0 %v10_v1, %s36_s0  ;;  %23 = vrot.lane.b32.xlu1 %v22_v2, %s37_s8  ;;  %v16_v4 = vld [vmem:[#allocation1 + $0x2] sm:$0x1]   ;;  %8 = vst.msk [vmem:[#allocation0] sm:$0x1] %vm7_vm0, %v6_v3  }
   0xe   :  { %17 = vrot.lane.b32.xlu0 %v16_v4, %s38_s9 }
  0x7c   :  { %v12_v5 = vpop.permute.xlu0 %11   ;;  %v24_v6 = vpop.permute.xlu1 %23  }
  0x7d   :  { %14 = vst.msk [vmem:[#allocation0] sm:$0x1] %vm13_vm1, %v12_v5  }
  0x80   :  { %v18_v7 = vpop.permute.xlu0 %17  }
  0x81   :  { %20 = vst.msk [vmem:[#allocation0] sm:$0x1] %vm19_vm2, %v18_v7  }
  0x82   :  { %26 = vst.msk [vmem:[#allocation0] sm:$0x1] %vm25_vm3, %v24_v6  }
  0x89   :  { %v30_v8 = vld [vmem:[#allocation0] sm:$0x1] }
  0x8a   :  { %32 = vst [vmem:[%s56_s1] sm:$0x1] %v30_v8 }

// kernel: autoencoder_forward.1
= control target key start
LH: loop header
LB: loop body
LE: loop exit
PB: predicated region body
PF: predicated region fallthrough
CT: control target
= control target key end

     0   :  { %s2152_s13 = smov 0   ;;  %s2345_s0 = inlined_call_operand.vmem [shape: f32[128,36], index: 0, kind: input, shape index: {}]   ;;  %s2346_s1 = inlined_call_operand.vmem [shape: f32[144,64], index: 1, kind: input, shape index: {}]   ;;  %s2347_s2 = inlined_call_operand.vmem [shape: f32[36,8], index: 2, kind: input, shape index: {}]   ;;  %s2348_s3 = inlined_call_operand.vmem [shape: f32[1,8], index: 3, kind: input, shape index: {}]   ;;  %s2349_s4 = inlined_call_operand.vmem [shape: f32[72,16], index: 4, kind: input, shape index: {}]   ;;  %s2350_s5 = inlined_call_operand.vmem [shape: f32[1,16], index: 5, kind: input, shape index: {}]   ;;  %s2351_s6 = inlined_call_operand.vmem [shape: f32[16,32], index: 6, kind: input, shape index: {}]   ;;  %s2352_s7 = inlined_call_operand.vmem [shape: f32[1,32], index: 7, kind: input, shape index: {}]   ;;  %s2353_s8 = inlined_call_operand.vmem [shape: f32[32,64], index: 8, kind: input, shape index: {}]   ;;  %s2354_s9 = inlined_call_operand.vmem [shape: f32[1,64], index: 9, kind: input, shape index: {}]   ;;  %s2355_s10 = inlined_call_operand.vmem [shape: f32[32,64], index: 10, kind: output, shape index: {}]  }
   0x1 LB: > { %s1761_s14 = sadd.s32 4294967295, %s2095_s13   ;;  %p1765_p0 = scmp.ge.s32.totalorder %s2095_s13, 1  ;;  %s2095_s13 = sphi %s2152_s13, %s20_s13  }
   0x2   : > { %p313_p1 = scmp.lt.s32.totalorder %s2095_s13, 3 }
   0x4   : > { %p314_p2 = pnand %p1765_p0, %p313_p1 }
   0x5   : > { %v371_v0 = vld [vmem:[%s2347_s2] sm:$0xff] (!%p314_p2)  ;;  %v372_v1 = vld [vmem:[%s2347_s2 + $0x8] sm:$0xff] (!%p314_p2)  ;;  %v373_v2 = vld [vmem:[%s2347_s2 + $0x10] sm:$0xff] (!%p314_p2)  ;;  %s1766_s21 = sshll.u32 (!%p314_p2), %s1761_s14, 3  ;;  %vm383_vm0 = vcmask (!%p314_p2), 293888   ;;  %vm408_vm1 = vcmask (!%p314_p2), 1043456  }
   0x6   : > { %317 = sbr.rel (%p314_p2) target bundleno = 1187 (0x4a3), region = 60  ;;  %v2029_v3 = vpack.c.bf16 (!%p314_p2), %v372_v1, %v371_v0  ;;  %v374_v4 = vld [vmem:[%s2347_s2 + $0x18] sm:$0xff] (!%p314_p2)  ;;  %p352_p3 = scmp.lt.s32.totalorder (!%p314_p2), %s1766_s21, 15  ;;  %v375_v6 = vld [vmem:[%s2347_s2 + $0x20] sm:$0xf] (!%p314_p2)  ;;  %vm543_vm2 = vcmask (!%p314_p2), 523264  }
   0x7   : > { %v2033_v5 = vpack.c.bf16 (!%p314_p2), %v374_v4, %v373_v2  ;;  %v525_v15 = vld [vmem:[%s2346_s1] sm:$0xff] (!%p314_p2)  ;;  %v754_v16 = vld [vmem:[%s2349_s4 + $0x8] sm:$0xff] (!%p314_p2)  ;;  %v527_v47 = vld [vmem:[%s2346_s1 + $0x10] sm:$0xff] (!%p314_p2)  ;;  %vm755_vm3 = vcmask (!%p314_p2), 64512   ;;  %vm1526_vm4 = vcmask (!%p314_p2), 130048   ;;  %vm1621_vm5 = vcmask (!%p314_p2), 261120  }
   0x8   : > { %2030 = vmatprep.subr.bf16.mxu0 (!%p314_p2), %v2029_v3  ;;  %1939 = vmatprep.mubr.msk.f32.mxu1 (!%p314_p2), %vm543_vm2, %v525_v15  ;;  %v1770_v17 = vld [vmem:[%s2348_s3] ss:$0 sm:$0xff] (!%p314_p2)  ;;  %v526_v46 = vld [vmem:[%s2346_s1 + $0x8] sm:$0xff] (!%p314_p2)  ;;  %v528_v48 = vld [vmem:[%s2346_s1 + $0x18] sm:$0xff] (!%p314_p2)  ;;  %s1768_s30 = sshll.u32 (!%p314_p2), %s1761_s14, 1 }
   0x9   : > { %2032 = vmatpush3.bf16.msra.mxu0 (!%p314_p2), %v2029_v3  ;;  %v529_v49 = vld [vmem:[%s2346_s1 + $0x20] sm:$0xff] (!%p314_p2)  ;;  %v530_v50 = vld [vmem:[%s2346_s1 + $0x28] sm:$0xff] (!%p314_p2)  ;;  %v531_v51 = vld [vmem:[%s2346_s1 + $0x30] sm:$0xff] (!%p314_p2)  ;;  %p358_p4 = scmp.lt.s32.totalorder (!%p314_p2), %s1768_s30, 3 }
   0xa   : > { %2034 = vmatprep.subr.bf16.mxu0 (!%p314_p2), %v2033_v5  ;;  %v532_v52 = vld [vmem:[%s2346_s1 + $0x38] sm:$0xff] (!%p314_p2)  ;;  %v533_v53 = vld [vmem:[%s2346_s1 + $0x40] sm:$0xff] (!%p314_p2)  ;;  %v534_v54 = vld [vmem:[%s2346_s1 + $0x48] sm:$0xff] (!%p314_p2) }
   0xb   : > { %v535_v55 = vld [vmem:[%s2346_s1 + $0x50] sm:$0xff] (!%p314_p2)  ;;  %v536_v56 = vld [vmem:[%s2346_s1 + $0x58] sm:$0xff] (!%p314_p2)  ;;  %v537_v57 = vld [vmem:[%s2346_s1 + $0x60] sm:$0xff] (!%p314_p2) }
   0xc   : > { %v538_v58 = vld [vmem:[%s2346_s1 + $0x68] sm:$0xff] (!%p314_p2)  ;;  %v539_v59 = vld [vmem:[%s2346_s1 + $0x70] sm:$0xff] (!%p314_p2)  ;;  %v540_v60 = vld [vmem:[%s2346_s1 + $0x78] sm:$0xff] (!%p314_p2) }
   0xd   : > { %s2357_s21 = smov (!%p352_p3, %s1766_s21), 15  ;;  %2036 = vmatpush3.bf16.msra.mxu0 %v2033_v5  ;;  %v541_v61 = vld [vmem:[%s2346_s1 + $0x80] sm:$0xff]  ;;  %v542_v62 = vld [vmem:[%s2346_s1 + $0x88] sm:$0xff]  ;;  %s2359_s30 = smov (!%p358_p4, %s1768_s30), 3 }
   0xe   : > { %s1767_s24 = sshll.u32 %s2357_s21, 3  ;;  %1909 = vmatprep.subr.msk.mxu0 %vm408_vm1, %v375_v6  ;;  %v753_v63 = vld [vmem:[%s2349_s4] sm:$0xff]  ;;  %v1518_v1 = vld [vmem:[%s2351_s6 + $0x8] sm:$0xff]  ;;  %s1769_s11 = sshll.u32 %s2359_s30, 3 }
   0xf   : > { %s355_s29 = scalar_lea.vmem %s2345_s0, %s1767_s24  ;;  %v1517_v0 = vld [vmem:[%s2351_s6] sm:$0xff]  ;;  %s361_s18 = scalar_lea.vmem %s2355_s10, %s1769_s11 }
  0x10   : > { %v363_v7 = vld [vmem:[%s355_s29] sm:$0xff]  ;;  %v364_v8 = vld [vmem:[%s355_s29 + $0x8] sm:$0xff]  ;;  %v365_v9 = vld [vmem:[%s355_s29 + $0x10] sm:$0xff]  ;;  %v2053_v2 = vpack.c.bf16 %v1518_v1, %v1517_v0 }
  0x11   : > { %1911 = vmatprep.mubr.msk.f32.mxu0 %vm383_vm0, %v363_v7  ;;  %1910 = vmatpush3.msk.msra.mxu0 %vm408_vm1, %v375_v6  ;;  %v366_v10 = vld [vmem:[%s355_s29 + $0x18] sm:$0xff]  ;;  %v367_v11 = vld [vmem:[%s355_s29 + $0x20] sm:$0xff]  ;;  %v368_v12 = vld [vmem:[%s355_s29 + $0x28] sm:$0xff] }
  0x12   : > { %1912 = vmatmul.mubr.msk.f32.vlgmr.msra.gmra.mrb[0].mxu0 %vm383_vm0, %v364_v8  ;;  %v369_v13 = vld [vmem:[%s355_s29 + $0x30] sm:$0xff]  ;;  %v370_v14 = vld [vmem:[%s355_s29 + $0x38] sm:$0xff]  ;;  %1966 = vmatprep.subr.mxu0 %v754_v16 }
  0x13   : > { %1914 = vmatprep.mubr.msk.f32.mxu0 %vm383_vm0, %v365_v9  ;;  %1967 = vmatpush3.msra.mxu0 %v754_v16  ;;  %v918_v7 = vld [vmem:[%s2349_s4 + $0x10] sm:$0xff] }
  0x14   : > { %1971 = vmatprep.subr.mxu0 %v753_v63 }
  0x16   : > { %1915 = vmatmul.mubr.msk.f32.gmra.mrb[2].mxu0 %vm383_vm0, %v366_v10 }
  0x17   : > { %1917 = vmatprep.mubr.msk.f32.mxu0 %vm383_vm0, %v367_v11 }
  0x1a   : > { %1918 = vmatmul.mubr.msk.f32.gmra.mrb[4].mxu0 %vm383_vm0, %v368_v12  ;;  %v1002_v12 = vld [vmem:[%s2349_s4 + $0x18] sm:$0xff] }
  0x1b   : > { %1920 = vmatprep.mubr.msk.f32.mxu0 %vm383_vm0, %v369_v13 }
  0x1e   : > { %1921 = vmatmul.mubr.msk.f32.gmra.mrb[6].mxu0 %vm383_vm0, %v370_v14 }
  0xe5   : > { %v1913_v18 = vpop.f32.mrb[0].mxu0 }
  0xe6   : > { %v484_v19 = vadd.f32 %v1913_v18, %v1770_v17  ;;  %v478_v20 = vpop.f32.mrb[1].mxu0 }
  0xe7   : > { %v479_v21 = vadd.f32 %v1770_v17, %v478_v20 }
  0xe8   : > { %v518_v22 = vmax.f32 %v484_v19, 0.0 }
  0xe9   : > { %v517_v23 = vmax.f32 %v479_v21, 0.0  ;;  %v1916_v24 = vpop.f32.mrb[2].mxu0 }
  0xea   : > { %v494_v25 = vadd.f32 %v1916_v24, %v1770_v17  ;;  %v488_v26 = vpop.f32.mrb[3].mxu0 }
  0xeb   : > { %v489_v27 = vadd.f32 %v1770_v17, %v488_v26  ;;  %v2037_v28 = vpack.c.bf16 %v518_v22, %v517_v23  ;;  %v1170_v22 = vld [vmem:[%s2349_s4 + $0x28] sm:$0xff]  ;;  %v1338_v26 = vld [vmem:[%s2349_s4 + $0x38] sm:$0xff] }
  0xec   : > { %v520_v29 = vmax.f32 %v494_v25, 0.0  ;;  %v1254_v25 = vld [vmem:[%s2349_s4 + $0x30] sm:$0xff] }
  0xed   : > { %v519_v30 = vmax.f32 %v489_v27, 0.0  ;;  %v1919_v31 = vpop.f32.mrb[4].mxu0  ;;  %2038 = vmatprep.subr.bf16.mxu1 %v2037_v28  ;;  %v1422_v27 = vld [vmem:[%s2349_s4 + $0x40] sm:$0xff] }
  0xee   : > { %v504_v32 = vadd.f32 %v1919_v31, %v1770_v17  ;;  %v498_v33 = vpop.f32.mrb[5].mxu0  ;;  %2040 = vmatpush3.bf16.msra.mxu1 %v2037_v28  ;;  %v1610_v28 = vld [vmem:[%s2353_s8] sm:$0xff] }
  0xef   : > { %v2041_v34 = vpack.c.bf16 %v520_v29, %v519_v30  ;;  %v499_v35 = vadd.f32 %v1770_v17, %v498_v33  ;;  %v1611_v29 = vld [vmem:[%s2353_s8 + $0x8] sm:$0xff]  ;;  %v1816_v31 = vld [vmem:[%s2350_s5] ss:$0 sm:$0xff] }
  0xf0   : > { %v522_v36 = vmax.f32 %v504_v32, 0.0  ;;  %v2057_v30 = vpack.c.bf16 %v1611_v29, %v1610_v28 }
  0xf1   : > { %v521_v37 = vmax.f32 %v499_v35, 0.0  ;;  %v1922_v38 = vpop.f32.mrb[6].mxu0  ;;  %2042 = vmatprep.subr.bf16.mxu1 %v2041_v34 }
  0xf2   : > { %v514_v39 = vadd.f32 %v1922_v38, %v1770_v17  ;;  %v508_v40 = vpop.f32.mrb[7].mxu0  ;;  %2044 = vmatpush3.bf16.msra.mxu1 %v2041_v34  ;;  %v1612_v38 = vld [vmem:[%s2353_s8 + $0x10] sm:$0xff] }
  0xf3   : > { %v2045_v41 = vpack.c.bf16 %v522_v36, %v521_v37  ;;  %v509_v42 = vadd.f32 %v1770_v17, %v508_v40  ;;  %v1086_v17 = vld [vmem:[%s2349_s4 + $0x20] sm:$0xff] }
  0xf4   : > { %v524_v43 = vmax.f32 %v514_v39, 0.0  ;;  %v1613_v39 = vld [vmem:[%s2353_s8 + $0x18] sm:$0xff] }
  0xf5   : > { %v523_v44 = vmax.f32 %v509_v42, 0.0  ;;  %2046 = vmatprep.subr.bf16.mxu1 %v2045_v41  ;;  %v2061_v40 = vpack.c.bf16 %v1613_v39, %v1612_v38 }
  0xf6   : > { %2048 = vmatpush3.bf16.msra.mxu1 %v2045_v41  ;;  %v1817_v41 = vld [vmem:[%s2352_s7] ss:$0 sm:$0xff] }
  0xf7   : > { %v2049_v45 = vpack.c.bf16 %v524_v43, %v523_v44 }
  0xf9   : > { %2050 = vmatprep.subr.bf16.mxu1 %v2049_v45 }
  0xfa   : > { %2052 = vmatpush3.bf16.msra.mxu1 %v2049_v45 }
  0xfb   : > { %2054 = vmatprep.subr.bf16.mxu1 %v2053_v2 }
  0xfd   : > { %1940 = vmatmul.mubr.msk.f32.vlgmr.msra.gmra.mrb[0].mxu1 %vm543_vm2, %v526_v46 }
  0xfe   : > { %1942 = vmatprep.mubr.msk.f32.mxu1 %vm543_vm2, %v527_v47  ;;  %2056 = vmatpush3.bf16.msra.mxu1 %v2053_v2 }
  0xff   : > { %2058 = vmatprep.subr.bf16.mxu1 %v2057_v30 }
 0x101   : > { %1943 = vmatmul.mubr.msk.f32.gmra.mrb[2].mxu1 %vm543_vm2, %v528_v48  ;;  %v1820_v48 = vld [vmem:[%s2354_s9] ss:$0 sm:$0xff] }
 0x102   : > { %1945 = vmatprep.mubr.msk.f32.mxu1 %vm543_vm2, %v529_v49 }
 0x105   : > { %1946 = vmatmul.mubr.msk.f32.gmra.mrb[4].mxu1 %vm543_vm2, %v530_v50 }
 0x106   : > { %1948 = vmatprep.mubr.msk.f32.mxu1 %vm543_vm2, %v531_v51 }
 0x109   : > { %1949 = vmatmul.mubr.msk.f32.gmra.mrb[6].mxu1 %vm543_vm2, %v532_v52 }
 0x10a   : > { %1951 = vmatprep.mubr.msk.f32.mxu1 %vm543_vm2, %v533_v53 }
 0x10d   : > { %1952 = vmatmul.mubr.msk.f32.gmra.mrb[8].mxu1 %vm543_vm2, %v534_v54 }
 0x10e   : > { %1954 = vmatprep.mubr.msk.f32.mxu1 %vm543_vm2, %v535_v55 }
 0x111   : > { %1955 = vmatmul.mubr.msk.f32.gmra.mrb[10].mxu1 %vm543_vm2, %v536_v56 }
 0x112   : > { %1957 = vmatprep.mubr.msk.f32.mxu1 %vm543_vm2, %v537_v57 }
 0x115   : > { %1958 = vmatmul.mubr.msk.f32.gmra.mrb[12].mxu1 %vm543_vm2, %v538_v58 }
 0x116   : > { %1960 = vmatprep.mubr.msk.f32.mxu1 %vm543_vm2, %v539_v59 }
 0x119   : > { %1961 = vmatmul.mubr.msk.f32.gmra.mrb[14].mxu1 %vm543_vm2, %v540_v60 }
 0x11a   : > { %1963 = vmatprep.mubr.msk.f32.mxu1 %vm543_vm2, %v541_v61 }
 0x11d   : > { %1964 = vmatmul.mubr.msk.f32.gmra.mrb[16].mxu1 %vm543_vm2, %v542_v62 }
 0x1d0   : > { %v1941_v3 = vpop.f32.mrb[0].mxu1 }
 0x1d1   : > { %v664_v4 = vpop.f32.mrb[1].mxu1 }
 0x1d4   : > { %v1944_v5 = vpop.f32.mrb[2].mxu1 }
 0x1d5   : > { %v674_v6 = vpop.f32.mrb[3].mxu1 }
 0x1d6   : > { %1968 = vmatprep.mubr.msk.f32.mxu0 %vm755_vm3, %v674_v6 }
 0x1d7   : > { %1969 = vmatmul.mubr.msk.f32.vlgmr.msra.gmra.mrb[8].mxu0 %vm755_vm3, %v1944_v5 }
 0x1d8   : > { %1972 = vmatpush3.msra.mxu0 %v753_v63  ;;  %1973 = vmatprep.mubr.msk.f32.mxu0 %vm755_vm3, %v664_v4  ;;  %v1947_v8 = vpop.f32.mrb[4].mxu1 }
 0x1d9   : > { %1976 = vmatprep.subr.mxu0 %v918_v7  ;;  %v684_v9 = vpop.f32.mrb[5].mxu1 }
 0x1dc   : > { %v1950_v10 = vpop.f32.mrb[6].mxu1 }
 0x1dd   : > { %v694_v11 = vpop.f32.mrb[7].mxu1 }
 0x1df   : > { %1974 = vmatmul.mubr.msk.f32.vlgmr.msra.gmra.mrb[8].mxu0 %vm755_vm3, %v1941_v3 }
 0x1e0   : > { %1977 = vmatpush3.msra.mxu0 %v918_v7  ;;  %1978 = vmatprep.mubr.msk.f32.mxu0 %vm755_vm3, %v684_v9  ;;  %v1953_v13 = vpop.f32.mrb[8].mxu1 }
 0x1e1   : > { %1981 = vmatprep.subr.mxu0 %v1002_v12  ;;  %v704_v14 = vpop.f32.mrb[9].mxu1 }
 0x1e4   : > { %v1956_v15 = vpop.f32.mrb[10].mxu1 }
 0x1e5   : > { %v714_v16 = vpop.f32.mrb[11].mxu1 }
 0x1e7   : > { %1979 = vmatmul.mubr.msk.f32.vlgmr.msra.gmra.mrb[8].mxu0 %vm755_vm3, %v1947_v8 }
 0x1e8   : > { %1982 = vmatpush3.msra.mxu0 %v1002_v12  ;;  %1983 = vmatprep.mubr.msk.f32.mxu0 %vm755_vm3, %v694_v11  ;;  %v1959_v18 = vpop.f32.mrb[12].mxu1 }
 0x1e9   : > { %1986 = vmatprep.subr.mxu0 %v1086_v17  ;;  %v724_v19 = vpop.f32.mrb[13].mxu1 }
 0x1ec   : > { %v1962_v20 = vpop.f32.mrb[14].mxu1 }
 0x1ed   : > { %v734_v21 = vpop.f32.mrb[15].mxu1 }
 0x1ef   : > { %1984 = vmatmul.mubr.msk.f32.vlgmr.msra.gmra.mrb[8].mxu0 %vm755_vm3, %v1950_v10 }
 0x1f0   : > { %1987 = vmatpush3.msra.mxu0 %v1086_v17  ;;  %1988 = vmatprep.mubr.msk.f32.mxu0 %vm755_vm3, %v704_v14  ;;  %v1965_v23 = vpop.f32.mrb[16].mxu1 }
 0x1f1   : > { %1991 = vmatprep.subr.mxu0 %v1170_v22  ;;  %v744_v24 = vpop.f32.mrb[17].mxu1 }
 0x1f7   : > { %1989 = vmatmul.mubr.msk.f32.vlgmr.msra.gmra.mrb[8].mxu0 %vm755_vm3, %v1953_v13 }
 0x1f8   : > { %1992 = vmatpush3.msra.mxu0 %v1170_v22  ;;  %1993 = vmatprep.mubr.msk.f32.mxu0 %vm755_vm3, %v714_v16 }
 0x1f9   : > { %1996 = vmatprep.subr.mxu0 %v1254_v25 }
 0x1ff   : > { %1994 = vmatmul.mubr.msk.f32.vlgmr.msra.gmra.mrb[8].mxu0 %vm755_vm3, %v1956_v15 }
 0x200   : > { %1997 = vmatpush3.msra.mxu0 %v1254_v25  ;;  %1998 = vmatprep.mubr.msk.f32.mxu0 %vm755_vm3, %v724_v19 }
 0x201   : > { %2001 = vmatprep.subr.mxu0 %v1338_v26 }
 0x207   : > { %1999 = vmatmul.mubr.msk.f32.vlgmr.msra.gmra.mrb[8].mxu0 %vm755_vm3, %v1959_v18 }
 0x208   : > { %2002 = vmatpush3.msra.mxu0 %v1338_v26  ;;  %2003 = vmatprep.mubr.msk.f32.mxu0 %vm755_vm3, %v734_v21 }
 0x209   : > { %2006 = vmatprep.subr.mxu0 %v1422_v27 }
 0x20f   : > { %2004 = vmatmul.mubr.msk.f32.vlgmr.msra.gmra.mrb[8].mxu0 %vm755_vm3, %v1962_v20 }
 0x210   : > { %2007 = vmatpush3.msra.mxu0 %v1422_v27  ;;  %2008 = vmatprep.mubr.msk.f32.mxu0 %vm755_vm3, %v744_v24 }
 0x217   : > { %2009 = vmatmul.mubr.msk.f32.vlgmr.msra.gmra.mrb[8].mxu0 %vm755_vm3, %v1965_v23 }
 0x2ea   : > { %v2010_v32 = vpop.f32.mrb[8].mxu0 }
 0x2eb   : > { %v1514_v33 = vadd.f32 %v2010_v32, %v1816_v31  ;;  %v1495_v34 = vpop.f32.mrb[9].mxu0 }
 0x2ec   : > { %v1513_v35 = vadd.f32 %v1816_v31, %v1495_v34 }
 0x2ed   : > { %v1516_v37 = vmax.f32 %v1514_v33, 0.0 }
 0x2ee   : > { %v1515_v36 = vmax.f32 %v1513_v35, 0.0 }
 0x2f0   : > { %2015 = vmatprep.mubr.msk.f32.mxu1 %vm1526_vm4, %v1515_v36 }
 0x2f1   : > { %2016 = vmatmul.mubr.msk.f32.vlgmr.msra.gmra.mrb[18].mxu1 %vm1526_vm4, %v1516_v37 }
 0x2f2   : > { %2060 = vmatpush3.bf16.msra.mxu1 %v2057_v30 }
 0x2f3   : > { %2062 = vmatprep.subr.bf16.mxu1 %v2061_v40 }
 0x2f6   : > { %2064 = vmatpush3.bf16.msra.mxu1 %v2061_v40 }
 0x3c4   : > { %v2017_v42 = vpop.f32.mrb[18].mxu1 }
 0x3c5   : > { %v1605_v43 = vadd.f32 %v2017_v42, %v1817_v41  ;;  %v1599_v44 = vpop.f32.mrb[19].mxu1 }
 0x3c6   : > { %v1600_v45 = vadd.f32 %v1817_v41, %v1599_v44 }
 0x3c7   : > { %v1609_v47 = vmax.f32 %v1605_v43, 0.0 }
 0x3c8   : > { %v1608_v46 = vmax.f32 %v1600_v45, 0.0 }
 0x3ca   : > { %2026 = vmatprep.mubr.msk.f32.mxu1 %vm1621_vm5, %v1608_v46 }
 0x3cb   : > { %2027 = vmatmul.mubr.msk.f32.vlgmr.msra.gmra.mrb[20].mxu1 %vm1621_vm5, %v1609_v47 }
 0x49e   : > { %v2028_v49 = vpop.f32.mrb[20].mxu1 }
 0x49f   : > { %v1694_v50 = vpop.f32.mrb[21].mxu1  ;;  %v1700_v52 = vadd.f32 %v2028_v49, %v1820_v48 }
 0x4a0   : > { %v1695_v51 = vadd.f32 %v1820_v48, %v1694_v50 }
 0x4a1   : > { %1704 = vst.msk [vmem:[%s361_s18 + $0x8] sm:$0xff] %vm543_vm2, %v1700_v52 }
 0x4a2   : > { %1703 = vst.msk [vmem:[%s361_s18] sm:$0xff] %vm543_vm2, %v1695_v51 }
 0x4a3 PF: > { %s20_s13 = sadd.s32 1, %s2095_s13  }
 0x4a4   : > { %p17_p5 = scmp.ge.s32.totalorder %s20_s13, 4  }
 0x4a6   :  { %19 = sbr.rel (!%p17_p5) target bundleno = 1 (0x1), region = 90 }

</bundles_post_ra>
